<compile_context>
chip_gen: v5e
topology: v5e:2x2
jax: 0.10.0
libtpu: 0.0.40
codegen_flags: <defaults>
</compile_context>

<pallas_src>
import functools

import jax
import jax.numpy as jnp
from jax import lax
from jax.experimental import pallas as pl
from jax.experimental.pallas import tpu as pltpu


def _round_up(v, m):
    return (v + m - 1) // m * m


def _fpft_kernel(lhs_ref, wd_ref, cb_ref, lw_ref, lb_ref, out_ref, *, tb, h, inv_hw):
    # NOTE: the NO-tile axis (grid axis 1) MUST remain the innermost, sequentially
    # iterated ("arbitrary") axis — out_ref is the accumulator across it.
    ni = pl.program_id(1)

    @pl.when(ni == 0)
    def _init():
        out_ref[...] = jnp.zeros_like(out_ref)

    # 3x3 conv for TB whole images: one MXU matmul of the KH-folded LHS against the
    # banded ("Toeplitz") weight slab for this NO tile, f32 accumulation.
    conv = jnp.dot(lhs_ref[...], wd_ref[...],
                   preferred_element_type=jnp.float32)            # (TB*H, TN)
    feat = jnp.maximum(conv + cb_ref[...], 0.0)                   # bias + ReLU (f32, VPU)

    # Global-average pool: sublane reduction over the H rows of each image, normalized
    # BEFORE the bf16 cast so magnitudes stay O(1).
    pooled = jnp.sum(feat.reshape(tb, h, feat.shape[-1]), axis=1) * inv_hw   # (TB, TN)

    # Partial linear head for this NO tile (the W part of the pool reduction is folded
    # into the W-tiled head weight; temperature folded in at trace time). Accumulate
    # into the resident, lane-dense output block.
    out_ref[...] += jnp.dot(pooled.astype(jnp.bfloat16), lw_ref[...],
                            preferred_element_type=jnp.float32)   # (TB, NCpad)

    @pl.when(ni == pl.num_programs(1) - 1)
    def _finalize():
        out_ref[...] += lb_ref[...]


def fpft_forward(x_nchw, conv_w, conv_b, lin_w, lin_b, temperature=1.0):
    """x_nchw: [B, Cin, H, W]  ->  [B, num_classes]."""
    B, Cin, H, W = x_nchw.shape
    KH, KW, _, Ch = conv_w.shape
    NC = lin_w.shape[-1]

    Wp = W + 2
    Kp = Wp * Cin                      # one padded image row, flattened
    K_raw = KH * Kp                    # KH-folded contraction width
    K = _round_up(K_raw, 128)          # pad to full MXU depth / unmasked vld
    NO = W * Ch                        # conv output lanes per row (lane-dense)
    NCpad = _round_up(NC, 128)         # lane-dense logits store

    # --- M blocking: fold whole images into the matmul M dim (M = TB*H). ---
    TB = B
    if B * H > 512:
        for cand in range(B - 1, 0, -1):
            if B % cand == 0 and cand % 8 == 0 and cand * H <= 512:
                TB = cand
                break

    # --- NO tiling: keep the banded-weight block bounded (v7x has only 64 MiB VMEM),
    #     and re-use the same kernel when W*Ch grows. ---
    TN = NO
    if NO % 128 == 0:
        budget = 16 * 1024 * 1024      # bf16 bytes of resident weight slabs per NO tile
        while (TN % 2 == 0 and (TN // 2) % 128 == 0
               and (K * TN + TN * NCpad) * 2 > budget):
            TN //= 2
    n_no = NO // TN

    # ---------------- layout glue (no 9x im2col; KH-fold only) ----------------
    x = jnp.transpose(x_nchw, (0, 2, 3, 1)).astype(jnp.float32)       # NHWC
    xp = jnp.pad(x, ((0, 0), (1, 1), (1, 1), (0, 0)))                 # SAME pad
    xp2 = xp.reshape(B, H + 2, Kp)
    # KH-only "im2col": output row h needs padded rows h, h+1, h+2 concatenated.
    # TODO(synk): for large images, build this window in-kernel (pl.ds slices or manual
    # DMA from an HBM-resident xp2) to avoid the KH-fold duplication in HBM.
    lhs = jnp.concatenate([xp2[:, dy:dy + H, :] for dy in range(KH)], axis=-1)
    lhs = jnp.pad(lhs, ((0, 0), (0, 0), (0, K - K_raw)))
    lhs = lhs.reshape(B * H, K).astype(jnp.bfloat16)                  # [B*H, K]

    # Banded ("Toeplitz") conv weights, KH bands stacked along the contraction dim:
    # wd[dy*Kp + p*Cin + ci, w*Ch + co] = conv_w[dy, p - w, ci, co] for 0 <= p - w < KW.
    sel = (jnp.arange(Wp)[None, None, :] ==
           (jnp.arange(W)[None, :, None] + jnp.arange(KW)[:, None, None])
           ).astype(jnp.float32)                                      # [KW, W, Wp]
    wd = jnp.einsum('xwp,yxio->ypiwo', sel, conv_w.astype(jnp.float32))
    wd = wd.reshape(K_raw, NO)
    wd = jnp.pad(wd, ((0, K - K_raw), (0, 0))).astype(jnp.bfloat16)   # [K, NO]

    cb = jnp.tile(conv_b.astype(jnp.float32), W).reshape(1, NO)
    # Head weight/bias: W-tiled (folds the lane part of the pool reduction), temperature
    # folded in, NC zero-padded to a lane-dense 128 (sliced back after the call).
    lw = jnp.tile(lin_w.astype(jnp.float32) * temperature, (W, 1))    # [NO, NC]
    lw = jnp.pad(lw, ((0, 0), (0, NCpad - NC))).astype(jnp.bfloat16)  # [NO, NCpad]
    lb = jnp.pad(lin_b.astype(jnp.float32) * temperature,
                 (0, NCpad - NC)).reshape(1, NCpad)

    kernel = functools.partial(_fpft_kernel, tb=TB, h=H, inv_hw=1.0 / float(H * W))

    flops = 2 * B * H * K * NO + 2 * B * NO * NCpad
    bytes_accessed = (lhs.size * 2 * n_no + wd.size * 2 + cb.size * 4 +
                      lw.size * 2 + lb.size * 4 + B * NCpad * 4)

    out = pl.pallas_call(
        kernel,
        out_shape=jax.ShapeDtypeStruct((B, NCpad), jnp.float32),
        grid=(B // TB, n_no),
        in_specs=[
            pl.BlockSpec((TB * H, K), lambda bi, ni: (bi, 0)),        # activations
            pl.BlockSpec((K, TN), lambda bi, ni: (0, ni)),            # banded conv weight
            pl.BlockSpec((1, TN), lambda bi, ni: (0, ni)),            # conv bias (W-tiled)
            pl.BlockSpec((TN, NCpad), lambda bi, ni: (ni, 0)),        # head weight (W-tiled)
            pl.BlockSpec((1, NCpad), lambda bi, ni: (0, 0)),          # head bias
        ],
        out_specs=pl.BlockSpec((TB, NCpad), lambda bi, ni: (bi, 0)),
        compiler_params=pltpu.CompilerParams(
            dimension_semantics=("parallel", "arbitrary"),
            vmem_limit_bytes=32 * 1024 * 1024),
        cost_estimate=pl.CostEstimate(flops=flops, transcendentals=0,
                                      bytes_accessed=bytes_accessed),
    )(lhs, wd, cb, lw, lb)
    return out[:, :NC]


def fpft_reference(x_nchw, conv_w, conv_b, lin_w, lin_b, temperature=1.0):
    """Pure-JAX f32 reference (conv via lax.conv_general_dilated)."""
    x = jnp.transpose(x_nchw, (0, 2, 3, 1)).astype(jnp.float32)
    y = lax.conv_general_dilated(
        x, conv_w.astype(jnp.float32),
        window_strides=(1, 1), padding="SAME",
        dimension_numbers=("NHWC", "HWIO", "NHWC"))
    y = jnp.maximum(y + conv_b[None, None, None, :], 0.0)
    pooled = jnp.mean(y, axis=(1, 2))                                 # [B, Ch]
    return (pooled @ lin_w.astype(jnp.float32) + lin_b) * temperature


if __name__ == "__main__":
    key = jax.random.PRNGKey(0)
    kx, kw, kb, klw, klb = jax.random.split(key, 5)

    B, Cin, H, W = 2, 4, 16, 16
    Ch, NC = 32, 8
    temperature = 0.5

    x = jax.random.normal(kx, (B, Cin, H, W), dtype=jnp.float32)
    conv_w = 0.1 * jax.random.normal(kw, (3, 3, Cin, Ch), dtype=jnp.float32)
    conv_b = 0.1 * jax.random.normal(kb, (Ch,), dtype=jnp.float32)
    lin_w = 0.1 * jax.random.normal(klw, (Ch, NC), dtype=jnp.float32)
    lin_b = 0.1 * jax.random.normal(klb, (NC,), dtype=jnp.float32)

    out = fpft_forward(x, conv_w, conv_b, lin_w, lin_b, temperature)
    out = jax.block_until_ready(out)

    ref = fpft_reference(x, conv_w, conv_b, lin_w, lin_b, temperature)
    assert out.shape == (B, NC)
    max_err = float(jnp.max(jnp.abs(out - ref)))
    # bf16 matmul operands vs f32 reference -> modest tolerance.
    assert jnp.allclose(out, ref, atol=3e-2, rtol=3e-2), (
        f"mismatch: max abs err = {max_err}")

    print("KERNEL_OK")
</pallas_src>

<mosaic_0001>
module attributes {stable_mosaic.version = 11 : i64} {
  func.func @_fpft_kernel(%arg0: i32, %arg1: i32, %arg2: memref<32x256xbf16, #tpu.memory_space<vmem>>, %arg3: memref<256x512xbf16, #tpu.memory_space<vmem>>, %arg4: memref<1x512xf32, #tpu.memory_space<vmem>>, %arg5: memref<512x128xbf16, #tpu.memory_space<vmem>>, %arg6: memref<1x128xf32, #tpu.memory_space<vmem>>, %arg7: memref<2x128xf32, #tpu.memory_space<vmem>>) attributes {dimension_semantics = [#tpu.dimension_semantics<parallel>, #tpu.dimension_semantics<arbitrary>], iteration_bounds = array<i64: 1, 1>, scalar_prefetch = 0 : i64, scratch_operands = 0 : i64, tpu.core_type = #tpu.core_type<tc>, window_params = [{transform_indices = @transform_0, window_bounds = array<i64: 32, 256>}, {transform_indices = @transform_1, window_bounds = array<i64: 256, 512>}, {transform_indices = @transform_2, window_bounds = array<i64: 1, 512>}, {transform_indices = @transform_3, window_bounds = array<i64: 512, 128>}, {pipeline_mode = #tpu.pipeline_mode<synchronous>, transform_indices = @transform_4, window_bounds = array<i64: 1, 128>}, {transform_indices = @transform_5, window_bounds = array<i64: 2, 128>}]} {
    %c0_i32 = arith.constant 0 : i32
    %0 = arith.cmpi eq, %arg1, %c0_i32 : i32
    %1 = arith.extui %0 : i1 to i32
    %c0_i32_0 = arith.constant 0 : i32
    %2 = arith.cmpi ne, %1, %c0_i32_0 : i32
    scf.if %2 {
      %cst_18 = arith.constant 0.000000e+00 : f32
      %24 = vector.broadcast %cst_18 : f32 to vector<2x128xf32>
      %c0_19 = arith.constant 0 : index
      %c0_20 = arith.constant 0 : index
      %25 = vector.load %arg7[%c0_19, %c0_20] : memref<2x128xf32, #tpu.memory_space<vmem>>, vector<2x128xf32>
      tpu.vector_store %arg7[%c0_19, %c0_20], %24 {strides = array<i32>} : memref<2x128xf32, #tpu.memory_space<vmem>>, vector<2x128xf32>,
    } else {
    }
    %c0 = arith.constant 0 : index
    %c0_1 = arith.constant 0 : index
    %3 = vector.load %arg2[%c0, %c0_1] : memref<32x256xbf16, #tpu.memory_space<vmem>>, vector<32x256xbf16>
    %c0_2 = arith.constant 0 : index
    %c0_3 = arith.constant 0 : index
    %4 = vector.load %arg3[%c0_2, %c0_3] : memref<256x512xbf16, #tpu.memory_space<vmem>>, vector<256x512xbf16>
    %cst = arith.constant dense<0.000000e+00> : vector<32x512xf32>
    %5 = tpu.matmul %3, %4, %cst {dimension_numbers = #tpu.dot_dimension_numbers<[1], [0], [0], [1], [0, 0, 1, 1], [], []>} : vector<32x256xbf16>, vector<256x512xbf16>, vector<32x512xf32> -> vector<32x512xf32>
    %c0_4 = arith.constant 0 : index
    %c0_5 = arith.constant 0 : index
    %6 = vector.load %arg4[%c0_4, %c0_5] : memref<1x512xf32, #tpu.memory_space<vmem>>, vector<1x512xf32>
    %7 = vector.broadcast %6 : vector<1x512xf32> to vector<32x512xf32>
    %8 = arith.addf %5, %7 : vector<32x512xf32>
    %cst_6 = arith.constant 0.000000e+00 : f32
    %9 = vector.broadcast %cst_6 : f32 to vector<32x512xf32>
    %10 = arith.maximumf %8, %9 : vector<32x512xf32>
    %11 = vector.shape_cast %10 : vector<32x512xf32> to vector<2x16x512xf32>
    %cst_7 = arith.constant dense<0.000000e+00> : vector<2x512xf32>
    %12 = vector.multi_reduction <add>, %11, %cst_7 [1] : vector<2x16x512xf32> to vector<2x512xf32>
    %cst_8 = arith.constant 3.906250e-03 : f32
    %13 = vector.broadcast %cst_8 : f32 to vector<2x512xf32>
    %14 = arith.mulf %12, %13 : vector<2x512xf32>
    %c0_9 = arith.constant 0 : index
    %c0_10 = arith.constant 0 : index
    %15 = vector.load %arg7[%c0_9, %c0_10] : memref<2x128xf32, #tpu.memory_space<vmem>>, vector<2x128xf32>
    %16 = arith.truncf %14 : vector<2x512xf32> to vector<2x512xbf16>
    %c0_11 = arith.constant 0 : index
    %c0_12 = arith.constant 0 : index
    %17 = vector.load %arg5[%c0_11, %c0_12] : memref<512x128xbf16, #tpu.memory_space<vmem>>, vector<512x128xbf16>
    %cst_13 = arith.constant dense<0.000000e+00> : vector<2x128xf32>
    %18 = tpu.matmul %16, %17, %cst_13 {dimension_numbers = #tpu.dot_dimension_numbers<[1], [0], [0], [1], [0, 0, 1, 1], [], []>} : vector<2x512xbf16>, vector<512x128xbf16>, vector<2x128xf32> -> vector<2x128xf32>
    %19 = arith.addf %15, %18 : vector<2x128xf32>
    %c0_14 = arith.constant 0 : index
    %c0_15 = arith.constant 0 : index
    %20 = vector.load %arg7[%c0_14, %c0_15] : memref<2x128xf32, #tpu.memory_space<vmem>>, vector<2x128xf32>
    tpu.vector_store %arg7[%c0_14, %c0_15], %19 {strides = array<i32>} : memref<2x128xf32, #tpu.memory_space<vmem>>, vector<2x128xf32>,
    %c0_i32_16 = arith.constant 0 : i32
    %21 = arith.cmpi eq, %arg1, %c0_i32_16 : i32
    %22 = arith.extui %21 : i1 to i32
    %c0_i32_17 = arith.constant 0 : i32
    %23 = arith.cmpi ne, %22, %c0_i32_17 : i32
    scf.if %23 {
      %c0_18 = arith.constant 0 : index
      %c0_19 = arith.constant 0 : index
      %24 = vector.load %arg7[%c0_18, %c0_19] : memref<2x128xf32, #tpu.memory_space<vmem>>, vector<2x128xf32>
      %c0_20 = arith.constant 0 : index
      %c0_21 = arith.constant 0 : index
      %25 = vector.load %arg6[%c0_20, %c0_21] : memref<1x128xf32, #tpu.memory_space<vmem>>, vector<1x128xf32>
      %26 = vector.broadcast %25 : vector<1x128xf32> to vector<2x128xf32>
      %27 = arith.addf %24, %26 : vector<2x128xf32>
      %c0_22 = arith.constant 0 : index
      %c0_23 = arith.constant 0 : index
      %28 = vector.load %arg7[%c0_22, %c0_23] : memref<2x128xf32, #tpu.memory_space<vmem>>, vector<2x128xf32>
      tpu.vector_store %arg7[%c0_22, %c0_23], %27 {strides = array<i32>} : memref<2x128xf32, #tpu.memory_space<vmem>>, vector<2x128xf32>,
    } else {
    }
    return
  }
  func.func @transform_0(%arg0: i32, %arg1: i32) -> (i32, i32) {
    %c0_i32 = arith.constant 0 : i32
    %c0_i32_0 = arith.constant 0 : i32
    return %arg0, %c0_i32 : i32, i32
  }
  func.func @transform_1(%arg0: i32, %arg1: i32) -> (i32, i32) {
    %c0_i32 = arith.constant 0 : i32
    %c0_i32_0 = arith.constant 0 : i32
    return %c0_i32, %arg1 : i32, i32
  }
  func.func @transform_2(%arg0: i32, %arg1: i32) -> (i32, i32) {
    %c0_i32 = arith.constant 0 : i32
    %c0_i32_0 = arith.constant 0 : i32
    return %c0_i32, %arg1 : i32, i32
  }
  func.func @transform_3(%arg0: i32, %arg1: i32) -> (i32, i32) {
    %c0_i32 = arith.constant 0 : i32
    %c0_i32_0 = arith.constant 0 : i32
    return %arg1, %c0_i32 : i32, i32
  }
  func.func @transform_4(%arg0: i32, %arg1: i32) -> (i32, i32) {
    %c0_i32 = arith.constant 0 : i32
    %c0_i32_0 = arith.constant 0 : i32
    %c0_i32_1 = arith.constant 0 : i32
    return %c0_i32, %c0_i32_0 : i32, i32
  }
  func.func @transform_5(%arg0: i32, %arg1: i32) -> (i32, i32) {
    %c0_i32 = arith.constant 0 : i32
    %c0_i32_0 = arith.constant 0 : i32
    return %arg0, %c0_i32 : i32, i32
  }
}

</mosaic_0001>

<bundles_post_ra>
// kernel: tpu_custom_call.1
= control target key start
LH: loop header
LB: loop body
LE: loop exit
PB: predicated region body
PF: predicated region fallthrough
CT: control target
= control target key end

     0   :  { %10 = vsyncpa [#allocation3], 0  ;;  %s1867_s0 = inlined_call_operand.hbm [shape: bf16[32,256], index: 0, kind: input, shape index: {}]   ;;  %s1868_s1 = inlined_call_operand.hbm [shape: bf16[256,512], index: 1, kind: input, shape index: {}]   ;;  %s1869_s2 = inlined_call_operand.hbm [shape: f32[1,512], index: 2, kind: input, shape index: {}]   ;;  %s1870_s3 = inlined_call_operand.hbm [shape: bf16[512,128], index: 3, kind: input, shape index: {}]   ;;  %s1871_s4 = inlined_call_operand.vmem [shape: f32[1,128], index: 4, kind: input, shape index: {}]   ;;  %s1872_s5 = inlined_call_operand.hbm [shape: f32[2,128], index: 5, kind: output, shape index: {}]  }
   0x1   :  { %11 = vsyncpa [#allocation6], 0 }
   0x2   :  { %12 = vsyncpa [#allocation9], 0  ;;  %s31_s20 = sshll.u32 %s1868_s1, 4  ;;  %s32_s20 = int_to_ptr.hbm [resolvable:$true] %s31_s20 }
   0x3   :  { %13 = vsyncpa [#allocation4], 0  ;;  %s1755_s21 = smov [#allocation5]   ;;  %s18_s25 = sshll.u32 %s1867_s0, 4  ;;  %s19_s25 = int_to_ptr.hbm [resolvable:$true] %s18_s25 }
   0x4   :  { %s33_s22 = sshll.u32 %s1755_s21, 4  ;;  %s1756_s26 = smov 256   ;;  %s34_s22 = int_to_ptr.vmem [resolvable:$true] %s33_s22 }
   0x5   :  { %s1757_s27 = smov 16   ;;  %s1758_s28 = smov [#allocation2]  }
   0x6   :  { %39 = dma.hbm_to_vmem [thread:$0]  %s32_s20, 8192, %s34_s22, [#allocation6], %s1756_s26, %s1756_s26, %s1757_s27  }
   0x7   :  { %s20_s29 = sshll.u32 %s1758_s28, 4  ;;  %s1759_s30 = smov 128   ;;  %s21_s29 = int_to_ptr.vmem [resolvable:$true] %s20_s29 }
   0x8   :  { %s1760_s6 = smov 8   ;;  %s45_s8 = sshll.u32 %s1869_s2, 4  ;;  %s46_s8 = int_to_ptr.hbm [resolvable:$true] %s45_s8 }
   0x9   :  { %26 = dma.hbm_to_vmem [thread:$0]  %s19_s25, 512, %s21_s29, [#allocation3], %s1759_s30, %s1759_s30, %s1760_s6  }
   0xa   :  { %s1761_s9 = smov [#allocation7]   ;;  %s55_s12 = sshll.u32 %s1870_s3, 4  ;;  %s56_s12 = int_to_ptr.hbm [resolvable:$true] %s55_s12 }
   0xb   :  { %s47_s10 = sshll.u32 %s1761_s9, 4  ;;  %s1762_s13 = smov [#allocation8]   ;;  %s48_s10 = int_to_ptr.vmem [resolvable:$true] %s47_s10 }
   0xc   :  { %50 = dma.hbm_to_vmem [thread:$0]  %s46_s8, 64, %s48_s10, [#allocation6]  }
   0xd   :  { %s57_s14 = sshll.u32 %s1762_s13, 4  ;;  %s1763_s15 = smov 64   ;;  %s58_s14 = int_to_ptr.vmem [resolvable:$true] %s57_s14 }
   0xe   :  { %s1764_s16 = smov 4  }
   0xf   :  { %63 = dma.hbm_to_vmem [thread:$0]  %s56_s12, 4096, %s58_s14, [#allocation9], %s1763_s15, %s1763_s15, %s1764_s16  }
  0x10   :  { %1747 = dma.done.wait [#allocation3], 512  }
  0x11   :  { %1748 = vsyncadd [#allocation3], 4294966784 }
  0x12   :  { %1749 = dma.done.wait [#allocation6], 8256  }
  0x13   :  { %1750 = vsyncadd [#allocation6], 4294959040 }
  0x14   :  { %1751 = dma.done.wait [#allocation9], 4096  }
  0x15   :  { %1752 = vsyncadd [#allocation9], 4294963200  ;;  %v1244_v0 = vld [vmem:[#allocation5 + $0xe0] sm:$0xf]  ;;  %v1548_v1 = vld [vmem:[#allocation5 + $0xec] sm:$0xf0] }
  0x16   :  { %v1372_v2 = vld [vmem:[#allocation5 + $0x1e0] sm:$0xf]  ;;  %v1245_v3 = vor.u32 %v1548_v1, %v1244_v0  ;;  %v1580_v4 = vld [vmem:[#allocation5 + $0x1ec] sm:$0xf0]  ;;  %v1546_v5 = vld [vmem:[#allocation5 + $0xe4] sm:$0xf] }
  0x17   :  { %v1246_v6 = vld [vmem:[#allocation5 + $0xf0] sm:$0xf0]  ;;  %v1373_v7 = vor.u32 %v1580_v4, %v1372_v2  ;;  %v1578_v9 = vld [vmem:[#allocation5 + $0x1e4] sm:$0xf]  ;;  %v1228_v11 = vld [vmem:[#allocation5 + $0xc0] sm:$0xf] }
  0x18   :  { %v1249_v8 = vor.u32 %v1546_v5, %v1246_v6  ;;  %v1374_v10 = vld [vmem:[#allocation5 + $0x1f0] sm:$0xf0]  ;;  %505 = vmatpush.bf16.msra.mxu0 %v1245_v3  ;;  %v1544_v13 = vld [vmem:[#allocation5 + $0xcc] sm:$0xf0]  ;;  %v1356_v14 = vld [vmem:[#allocation5 + $0x1c0] sm:$0xf] }
  0x19   :  { %v1377_v12 = vor.u32 %v1578_v9, %v1374_v10  ;;  %v1576_v15 = vld [vmem:[#allocation5 + $0x1cc] sm:$0xf0]  ;;  %524 = vmatpush.bf16.msra.mxu1 %v1373_v7  ;;  %v1229_v16 = vor.u32 %v1544_v13, %v1228_v11  ;;  %v1542_v18 = vld [vmem:[#allocation5 + $0xc4] sm:$0xf]  ;;  %v1230_v19 = vld [vmem:[#allocation5 + $0xd0] sm:$0xf0] }
  0x1a   :  { %543 = vmatpush.bf16.msra.mxu2 %v1249_v8  ;;  %v1357_v17 = vor.u32 %v1576_v15, %v1356_v14  ;;  %v1574_v20 = vld [vmem:[#allocation5 + $0x1c4] sm:$0xf]  ;;  %v1233_v21 = vor.u32 %v1542_v18, %v1230_v19  ;;  %v1358_v22 = vld [vmem:[#allocation5 + $0x1d0] sm:$0xf0]  ;;  %v1212_v23 = vld [vmem:[#allocation5 + $0xa0] sm:$0xf] }
  0x1b   :  { %562 = vmatpush.bf16.msra.mxu3 %v1377_v12  ;;  %v1540_v24 = vld [vmem:[#allocation5 + $0xac] sm:$0xf0]  ;;  %v1361_v25 = vor.u32 %v1574_v20, %v1358_v22  ;;  %v1340_v26 = vld [vmem:[#allocation5 + $0x1a0] sm:$0xf]  ;;  %v1538_v28 = vld [vmem:[#allocation5 + $0xa4] sm:$0xf] }
  0x1c   :  { %v1572_v27 = vld [vmem:[#allocation5 + $0x1ac] sm:$0xf0]  ;;  %506 = vmatpush.bf16.msra.mxu0 %v1229_v16  ;;  %v1213_v29 = vor.u32 %v1540_v24, %v1212_v23  ;;  %v1214_v30 = vld [vmem:[#allocation5 + $0xb0] sm:$0xf0]  ;;  %v1570_v31 = vld [vmem:[#allocation5 + $0x1a4] sm:$0xf] }
  0x1d   :  { %v1342_v32 = vld [vmem:[#allocation5 + $0x1b0] sm:$0xf0]  ;;  %525 = vmatpush.bf16.msra.mxu1 %v1357_v17  ;;  %v1341_v33 = vor.u32 %v1572_v27, %v1340_v26  ;;  %v1217_v34 = vor.u32 %v1538_v28, %v1214_v30  ;;  %v1196_v35 = vld [vmem:[#allocation5 + $0x80] sm:$0xf]  ;;  %v1536_v36 = vld [vmem:[#allocation5 + $0x8c] sm:$0xf0] }
  0x1e   :  { %544 = vmatpush.bf16.msra.mxu2 %v1233_v21  ;;  %v1324_v37 = vld [vmem:[#allocation5 + $0x180] sm:$0xf]  ;;  %v1345_v38 = vor.u32 %v1570_v31, %v1342_v32  ;;  %v1568_v39 = vld [vmem:[#allocation5 + $0x18c] sm:$0xf0]  ;;  %v1534_v40 = vld [vmem:[#allocation5 + $0x84] sm:$0xf]  ;;  %v1197_v44 = vor.u32 %v1536_v36, %v1196_v35 }
  0x1f   :  { %563 = vmatpush.bf16.msra.mxu3 %v1361_v25  ;;  %v1198_v41 = vld [vmem:[#allocation5 + $0x90] sm:$0xf0]  ;;  %v1566_v42 = vld [vmem:[#allocation5 + $0x184] sm:$0xf]  ;;  %v1325_v45 = vor.u32 %v1568_v39, %v1324_v37  ;;  %v1180_v47 = vld [vmem:[#allocation5 + $0x60] sm:$0xf] }
  0x20   :  { %v1326_v43 = vld [vmem:[#allocation5 + $0x190] sm:$0xf0]  ;;  %507 = vmatpush.bf16.msra.mxu0 %v1213_v29  ;;  %v1201_v46 = vor.u32 %v1534_v40, %v1198_v41  ;;  %v1532_v48 = vld [vmem:[#allocation5 + $0x6c] sm:$0xf0]  ;;  %v1308_v49 = vld [vmem:[#allocation5 + $0x160] sm:$0xf] }
  0x21   :  { %526 = vmatpush.bf16.msra.mxu1 %v1341_v33  ;;  %v1329_v50 = vor.u32 %v1566_v42, %v1326_v43  ;;  %v1564_v51 = vld [vmem:[#allocation5 + $0x16c] sm:$0xf0]  ;;  %v1530_v52 = vld [vmem:[#allocation5 + $0x64] sm:$0xf]  ;;  %v1182_v53 = vld [vmem:[#allocation5 + $0x70] sm:$0xf0]  ;;  %v1181_v56 = vor.u32 %v1532_v48, %v1180_v47 }
  0x22   :  { %545 = vmatpush.bf16.msra.mxu2 %v1217_v34  ;;  %v1562_v54 = vld [vmem:[#allocation5 + $0x164] sm:$0xf]  ;;  %v1310_v55 = vld [vmem:[#allocation5 + $0x170] sm:$0xf0]  ;;  %v1309_v57 = vor.u32 %v1564_v51, %v1308_v49  ;;  %v1185_v58 = vor.u32 %v1530_v52, %v1182_v53  ;;  %v1164_v59 = vld [vmem:[#allocation5 + $0x40] sm:$0xf] }
  0x23   :  { %564 = vmatpush.bf16.msra.mxu3 %v1345_v38  ;;  %v1528_v60 = vld [vmem:[#allocation5 + $0x4c] sm:$0xf0]  ;;  %v1292_v61 = vld [vmem:[#allocation5 + $0x140] sm:$0xf]  ;;  %v1313_v62 = vor.u32 %v1562_v54, %v1310_v55  ;;  %v1526_v0 = vld [vmem:[#allocation5 + $0x44] sm:$0xf] }
  0x24   :  { %508 = vmatpush.bf16.msra.mxu0 %v1197_v44  ;;  %v1560_v63 = vld [vmem:[#allocation5 + $0x14c] sm:$0xf0]  ;;  %v1166_v1 = vld [vmem:[#allocation5 + $0x50] sm:$0xf0]  ;;  %v1558_v2 = vld [vmem:[#allocation5 + $0x144] sm:$0xf]  ;;  %v1165_v4 = vor.u32 %v1528_v60, %v1164_v59 }
  0x25   :  { %527 = vmatpush.bf16.msra.mxu1 %v1325_v45  ;;  %v1294_v3 = vld [vmem:[#allocation5 + $0x150] sm:$0xf0]  ;;  %v1293_v5 = vor.u32 %v1560_v63, %v1292_v61  ;;  %v1169_v6 = vor.u32 %v1526_v0, %v1166_v1  ;;  %v1148_v7 = vld [vmem:[#allocation5 + $0x20] sm:$0xf]  ;;  %v1524_v8 = vld [vmem:[#allocation5 + $0x2c] sm:$0xf0] }
  0x26   :  { %546 = vmatpush.bf16.msra.mxu2 %v1201_v46  ;;  %v1276_v9 = vld [vmem:[#allocation5 + $0x120] sm:$0xf]  ;;  %v1297_v10 = vor.u32 %v1558_v2, %v1294_v3  ;;  %v1556_v11 = vld [vmem:[#allocation5 + $0x12c] sm:$0xf0]  ;;  %v1522_v12 = vld [vmem:[#allocation5 + $0x24] sm:$0xf]  ;;  %v1149_v16 = vor.u32 %v1524_v8, %v1148_v7 }
  0x27   :  { %565 = vmatpush.bf16.msra.mxu3 %v1329_v50  ;;  %v1150_v13 = vld [vmem:[#allocation5 + $0x30] sm:$0xf0]  ;;  %v1554_v14 = vld [vmem:[#allocation5 + $0x124] sm:$0xf]  ;;  %v1132_v17 = vld [vmem:[#allocation5] sm:$0xf]  ;;  %v1277_v19 = vor.u32 %v1556_v11, %v1276_v9 }
  0x28   :  { %509 = vmatpush.bf16.msra.mxu0 %v1181_v56  ;;  %v1278_v15 = vld [vmem:[#allocation5 + $0x130] sm:$0xf0]  ;;  %v1520_v18 = vld [vmem:[#allocation5 + $0xc] sm:$0xf0]  ;;  %v1153_v20 = vor.u32 %v1522_v12, %v1150_v13  ;;  %v1260_v21 = vld [vmem:[#allocation5 + $0x100] sm:$0xf] }
  0x29   :  { %528 = vmatpush.bf16.msra.mxu1 %v1309_v57  ;;  %v1552_v22 = vld [vmem:[#allocation5 + $0x10c] sm:$0xf0]  ;;  %v1518_v23 = vld [vmem:[#allocation5 + $0x4] sm:$0xf]  ;;  %v1281_v24 = vor.u32 %v1554_v14, %v1278_v15  ;;  %v1134_v25 = vld [vmem:[#allocation5 + $0x10] sm:$0xf0]  ;;  %v1133_v31 = vor.u32 %v1520_v18, %v1132_v17 }
  0x2a   :  { %547 = vmatpush.bf16.msra.mxu2 %v1185_v58  ;;  %v1550_v26 = vld [vmem:[#allocation5 + $0x104] sm:$0xf]  ;;  %v1262_v27 = vld [vmem:[#allocation5 + $0x110] sm:$0xf0]  ;;  %v1116_v28 = vld [vmem:[#allocation2] sm:$0xf]  ;;  %v1261_v35 = vor.u32 %v1552_v22, %v1260_v21  ;;  %v1137_v36 = vor.u32 %v1518_v23, %v1134_v25 }
  0x2b   :  { %566 = vmatpush.bf16.msra.mxu3 %v1313_v62  ;;  %v1547_v29 = vld [vmem:[#allocation5 + $0xec] sm:$0xf]  ;;  %v1254_v30 = vld [vmem:[#allocation5 + $0xf8] sm:$0xf0]  ;;  %v1515_v32 = vld [vmem:[#allocation2 + $0x4] sm:$0xf0]  ;;  %v1265_v39 = vor.u32 %v1550_v26, %v1262_v27 }
  0x2c   :  { %510 = vmatpush.bf16.msra.mxu0 %v1165_v4  ;;  %v1380_v33 = vld [vmem:[#allocation5 + $0x1e8] sm:$0xf]  ;;  %v1581_v34 = vld [vmem:[#allocation5 + $0x1f4] sm:$0xf0]  ;;  %v1514_v37 = vld [vmem:[#allocation2 + $0x4] sm:$0xf]  ;;  %v1257_v40 = vor.u32 %v1547_v29, %v1254_v30  ;;  %v1809_v44 = vor.u32 %v1515_v32, %v1116_v28 }
  0x2d   :  { %529 = vmatpush.bf16.msra.mxu1 %v1293_v5  ;;  %v1118_v38 = vld [vmem:[#allocation2 + $0x8] sm:$0xf0]  ;;  %v1252_v41 = vld [vmem:[#allocation5 + $0xe8] sm:$0xf]  ;;  %v1549_v42 = vld [vmem:[#allocation5 + $0xf4] sm:$0xf0]  ;;  %v1381_v45 = vor.u32 %v1581_v34, %v1380_v33 }
  0x2e   :  { %548 = vmatpush.bf16.msra.mxu2 %v1169_v6  ;;  %v1579_v43 = vld [vmem:[#allocation5 + $0x1ec] sm:$0xf]  ;;  %v1382_v46 = vld [vmem:[#allocation5 + $0x1f8] sm:$0xf0]  ;;  %v1811_v49 = vor.u32 %v1514_v37, %v1118_v38  ;;  %v1364_v50 = vld [vmem:[#allocation5 + $0x1c8] sm:$0xf]  ;;  %v1253_v52 = vor.u32 %v1549_v42, %v1252_v41 }
  0x2f   :  { %567 = vmatpush.bf16.msra.mxu3 %v1297_v10  ;;  %v1543_v47 = vld [vmem:[#allocation5 + $0xcc] sm:$0xf]  ;;  %v1238_v48 = vld [vmem:[#allocation5 + $0xd8] sm:$0xf0]  ;;  %v1577_v51 = vld [vmem:[#allocation5 + $0x1d4] sm:$0xf0]  ;;  %v1385_v53 = vor.u32 %v1579_v43, %v1382_v46 }
  0x30   :  { %511 = vmatpush.bf16.msra.mxu0 %v1149_v16  ;;  %v1241_v54 = vor.u32 %v1543_v47, %v1238_v48  ;;  %v1236_v55 = vld [vmem:[#allocation5 + $0xc8] sm:$0xf]  ;;  %v1545_v56 = vld [vmem:[#allocation5 + $0xd4] sm:$0xf0]  ;;  %v1575_v57 = vld [vmem:[#allocation5 + $0x1cc] sm:$0xf]  ;;  %v1365_v58 = vor.u32 %v1577_v51, %v1364_v50 }
  0x31   :  { %530 = vmatpush.bf16.msra.mxu1 %v1277_v19  ;;  %v1366_v59 = vld [vmem:[#allocation5 + $0x1d8] sm:$0xf0]  ;;  %v1539_v60 = vld [vmem:[#allocation5 + $0xac] sm:$0xf]  ;;  %v1348_v62 = vld [vmem:[#allocation5 + $0x1a8] sm:$0xf]  ;;  %v1237_v0 = vor.u32 %v1545_v56, %v1236_v55 }
  0x32   :  { %549 = vmatpush.bf16.msra.mxu2 %v1153_v20  ;;  %v1222_v61 = vld [vmem:[#allocation5 + $0xb8] sm:$0xf0]  ;;  %v1573_v63 = vld [vmem:[#allocation5 + $0x1b4] sm:$0xf0]  ;;  %v1369_v1 = vor.u32 %v1575_v57, %v1366_v59  ;;  %v1220_v3 = vld [vmem:[#allocation5 + $0xa8] sm:$0xf] }
  0x33   :  { %568 = vmatpush.bf16.msra.mxu3 %v1281_v24  ;;  %v1225_v2 = vor.u32 %v1539_v60, %v1222_v61  ;;  %v1541_v4 = vld [vmem:[#allocation5 + $0xb4] sm:$0xf0]  ;;  %v1571_v5 = vld [vmem:[#allocation5 + $0x1ac] sm:$0xf]  ;;  %v1349_v6 = vor.u32 %v1573_v63, %v1348_v62  ;;  %v1350_v7 = vld [vmem:[#allocation5 + $0x1b8] sm:$0xf0] }
  0x34   :  { %512 = vmatpush.bf16.msra.mxu0 %v1133_v31  ;;  %v1535_v8 = vld [vmem:[#allocation5 + $0x8c] sm:$0xf]  ;;  %v1206_v9 = vld [vmem:[#allocation5 + $0x98] sm:$0xf0]  ;;  %v1332_v10 = vld [vmem:[#allocation5 + $0x188] sm:$0xf]  ;;  %v1221_v12 = vor.u32 %v1541_v4, %v1220_v3  ;;  %v1353_v14 = vor.u32 %v1571_v5, %v1350_v7 }
  0x35   :  { %531 = vmatpush.bf16.msra.mxu1 %v1261_v35  ;;  %v1569_v11 = vld [vmem:[#allocation5 + $0x194] sm:$0xf0]  ;;  %v1204_v13 = vld [vmem:[#allocation5 + $0x88] sm:$0xf]  ;;  %v1209_v15 = vor.u32 %v1535_v8, %v1206_v9  ;;  %v1567_v17 = vld [vmem:[#allocation5 + $0x18c] sm:$0xf] }
  0x36   :  { %550 = vmatpush.bf16.msra.mxu2 %v1137_v36  ;;  %v1537_v16 = vld [vmem:[#allocation5 + $0x94] sm:$0xf0]  ;;  %v1334_v18 = vld [vmem:[#allocation5 + $0x198] sm:$0xf0]  ;;  %v1333_v19 = vor.u32 %v1569_v11, %v1332_v10  ;;  %v1124_v20 = vld [vmem:[#allocation2 + $0x10] sm:$0xf] }
  0x37   :  { %569 = vmatpush.bf16.msra.mxu3 %v1265_v39  ;;  %513 = vmatmul.bf16.vlgmr.msra.gmra.mxu0 %v1809_v44  ;;  %v1531_v21 = vld [vmem:[#allocation5 + $0x6c] sm:$0xf]  ;;  %v1190_v22 = vld [vmem:[#allocation5 + $0x78] sm:$0xf0]  ;;  %v1517_v23 = vld [vmem:[#allocation2 + $0x14] sm:$0xf0]  ;;  %v1205_v26 = vor.u32 %v1537_v16, %v1204_v13  ;;  %v1337_v30 = vor.u32 %v1567_v17, %v1334_v18 }
  0x38   :  { %532 = vmatmul.bf16.vlgmr.msra.gmra.mxu1 %v1811_v49  ;;  %581 = vmatpush.bf16.msrb.mxu0 %v1253_v52  ;;  %v1316_v24 = vld [vmem:[#allocation5 + $0x168] sm:$0xf]  ;;  %v1565_v25 = vld [vmem:[#allocation5 + $0x174] sm:$0xf0]  ;;  %v1516_v27 = vld [vmem:[#allocation2 + $0x14] sm:$0xf]  ;;  %v1193_v31 = vor.u32 %v1531_v21, %v1190_v22  ;;  %v1817_v34 = vor.u32 %v1517_v23, %v1124_v20 }
  0x39   :  { %600 = vmatpush.bf16.msrb.mxu1 %v1381_v45  ;;  %551 = vmatmul.bf16.vlgmr.msra.gmra.mxu2 %v1809_v44  ;;  %v1126_v28 = vld [vmem:[#allocation2 + $0x18] sm:$0xf0]  ;;  %v1188_v29 = vld [vmem:[#allocation5 + $0x68] sm:$0xf]  ;;  %v1533_v32 = vld [vmem:[#allocation5 + $0x74] sm:$0xf0]  ;;  %v1317_v35 = vor.u32 %v1565_v25, %v1316_v24 }
  0x3a   :  { %619 = vmatpush.bf16.msrb.mxu2 %v1257_v40  ;;  %570 = vmatmul.bf16.vlgmr.msra.gmra.mxu3 %v1811_v49  ;;  %v1563_v33 = vld [vmem:[#allocation5 + $0x16c] sm:$0xf]  ;;  %v1318_v36 = vld [vmem:[#allocation5 + $0x178] sm:$0xf0]  ;;  %v1819_v39 = vor.u32 %v1516_v27, %v1126_v28  ;;  %v1300_v40 = vld [vmem:[#allocation5 + $0x148] sm:$0xf]  ;;  %v1189_v42 = vor.u32 %v1533_v32, %v1188_v29 }
  0x3b   :  { %638 = vmatpush.bf16.msrb.mxu3 %v1385_v53  ;;  %v1527_v37 = vld [vmem:[#allocation5 + $0x4c] sm:$0xf]  ;;  %v1174_v38 = vld [vmem:[#allocation5 + $0x58] sm:$0xf0]  ;;  %v1561_v41 = vld [vmem:[#allocation5 + $0x154] sm:$0xf0]  ;;  %v1321_v43 = vor.u32 %v1563_v33, %v1318_v36 }
  0x3c   :  { %582 = vmatpush.bf16.msrb.mxu0 %v1237_v0  ;;  %v1177_v45 = vor.u32 %v1527_v37, %v1174_v38  ;;  %v1172_v46 = vld [vmem:[#allocation5 + $0x48] sm:$0xf]  ;;  %v1529_v47 = vld [vmem:[#allocation5 + $0x54] sm:$0xf0]  ;;  %v1559_v48 = vld [vmem:[#allocation5 + $0x14c] sm:$0xf]  ;;  %v1301_v50 = vor.u32 %v1561_v41, %v1300_v40 }
  0x3d   :  { %601 = vmatpush.bf16.msrb.mxu1 %v1365_v58  ;;  %v1302_v51 = vld [vmem:[#allocation5 + $0x158] sm:$0xf0]  ;;  %v1523_v52 = vld [vmem:[#allocation5 + $0x2c] sm:$0xf]  ;;  %v1557_v55 = vld [vmem:[#allocation5 + $0x134] sm:$0xf0]  ;;  %v1173_v56 = vor.u32 %v1529_v47, %v1172_v46 }
  0x3e   :  { %620 = vmatpush.bf16.msrb.mxu2 %v1241_v54  ;;  %v1158_v53 = vld [vmem:[#allocation5 + $0x38] sm:$0xf0]  ;;  %v1284_v54 = vld [vmem:[#allocation5 + $0x128] sm:$0xf]  ;;  %v1305_v57 = vor.u32 %v1559_v48, %v1302_v51  ;;  %v1525_v60 = vld [vmem:[#allocation5 + $0x34] sm:$0xf0] }
  0x3f   :  { %639 = vmatpush.bf16.msrb.mxu3 %v1369_v1  ;;  %v1161_v58 = vor.u32 %v1523_v52, %v1158_v53  ;;  %v1156_v59 = vld [vmem:[#allocation5 + $0x28] sm:$0xf]  ;;  %v1555_v61 = vld [vmem:[#allocation5 + $0x12c] sm:$0xf]  ;;  %v1285_v62 = vor.u32 %v1557_v55, %v1284_v54  ;;  %v1286_v63 = vld [vmem:[#allocation5 + $0x138] sm:$0xf0] }
  0x40   :  { %583 = vmatpush.bf16.msrb.mxu0 %v1221_v12  ;;  %v1519_v0 = vld [vmem:[#allocation5 + $0xc] sm:$0xf]  ;;  %v1142_v1 = vld [vmem:[#allocation5 + $0x18] sm:$0xf0]  ;;  %v1553_v3 = vld [vmem:[#allocation5 + $0x114] sm:$0xf0]  ;;  %v1157_v4 = vor.u32 %v1525_v60, %v1156_v59  ;;  %v1289_v5 = vor.u32 %v1555_v61, %v1286_v63 }
  0x41   :  { %602 = vmatpush.bf16.msrb.mxu1 %v1349_v6  ;;  %v1145_v6 = vor.u32 %v1519_v0, %v1142_v1  ;;  %v1140_v7 = vld [vmem:[#allocation5 + $0x8] sm:$0xf]  ;;  %v1521_v8 = vld [vmem:[#allocation5 + $0x14] sm:$0xf0]  ;;  %v1551_v10 = vld [vmem:[#allocation5 + $0x10c] sm:$0xf] }
  0x42   :  { %621 = vmatpush.bf16.msrb.mxu2 %v1225_v2  ;;  %v1268_v2 = vld [vmem:[#allocation5 + $0x108] sm:$0xf]  ;;  %v1270_v11 = vld [vmem:[#allocation5 + $0x118] sm:$0xf0]  ;;  %v1141_v12 = vor.u32 %v1521_v8, %v1140_v7  ;;  %v1833_v17 = vld [vmem:[#allocation7] sm:$0xf] }
  0x43   :  { %640 = vmatpush.bf16.msrb.mxu3 %v1353_v14  ;;  %v1269_v9 = vor.u32 %v1553_v3, %v1268_v2  ;;  %v1273_v13 = vor.u32 %v1551_v10, %v1270_v11  ;;  %v1589_v14 = vld [vmem:[#allocation8 + $0x38] sm:$0xff]  ;;  %v1587_v18 = vld [vmem:[#allocation8 + $0x28] sm:$0xff]  ;;  %v1596_v20 = vld [vmem:[#allocation8 + $0x70] sm:$0xff]  ;;  %vm826_vm0 = vcmask 1041409   ;;  %s1766_s17 = smov [#allocation10]   ;;  %s1102_s21 = sshll.u32 %s1872_s5, 4  ;;  %s1103_s21 = int_to_ptr.hbm [resolvable:$true] %s1102_s21 }
  0x44   :  { %584 = vmatpush.bf16.msrb.mxu0 %v1205_v26  ;;  %v1597_v16 = vld [vmem:[#allocation8 + $0x78] sm:$0xff]  ;;  %v1586_v21 = vld [vmem:[#allocation8 + $0x20] sm:$0xff]  ;;  %v1595_v23 = vld [vmem:[#allocation8 + $0x68] sm:$0xff]  ;;  %v1837_v26 = vperm.slane %v1833_v17, 1  ;;  %s1100_s18 = sshll.u32 %s1766_s17, 4  ;;  %s1101_s18 = int_to_ptr.vmem [resolvable:$true] %s1100_s18 }
  0x45   :  { %603 = vmatpush.bf16.msrb.mxu1 %v1333_v19  ;;  %v1585_v25 = vld [vmem:[#allocation8 + $0x18] sm:$0xff]  ;;  %v1594_v32 = vld [vmem:[#allocation8 + $0x60] sm:$0xff]  ;;  %v1583_v41 = vld [vmem:[#allocation8 + $0x8] sm:$0xff] }
  0x46   :  { %622 = vmatpush.bf16.msrb.mxu2 %v1209_v15  ;;  %v1588_v15 = vld [vmem:[#allocation8 + $0x30] sm:$0xff]  ;;  %v1593_v38 = vld [vmem:[#allocation8 + $0x58] sm:$0xff]  ;;  %v1582_v52 = vld [vmem:[#allocation8] sm:$0xff] }
  0x47   :  { %641 = vmatpush.bf16.msrb.mxu3 %v1337_v30  ;;  %518 = vmatmul.bf16.gmra.mxu0 %v1817_v34  ;;  %v1605_v60 = vld [vmem:[#allocation8 + $0xb8] sm:$0xff] }
  0x48   :  { %537 = vmatmul.bf16.gmra.mxu1 %v1819_v39  ;;  %585 = vmatpush.bf16.msrb.mxu0 %v1189_v42 }
  0x49   :  { %604 = vmatpush.bf16.msrb.mxu1 %v1317_v35  ;;  %556 = vmatmul.bf16.gmra.mxu2 %v1817_v34 }
  0x4a   :  { %623 = vmatpush.bf16.msrb.mxu2 %v1193_v31  ;;  %575 = vmatmul.bf16.gmra.mxu3 %v1819_v39 }
  0x4b   :  { %642 = vmatpush.bf16.msrb.mxu3 %v1321_v43 }
  0x4c   :  { %586 = vmatpush.bf16.msrb.mxu0 %v1173_v56 }
  0x4d   :  { %605 = vmatpush.bf16.msrb.mxu1 %v1301_v50  ;;  %v1592_v50 = vld [vmem:[#allocation8 + $0x50] sm:$0xff] }
  0x4e   :  { %624 = vmatpush.bf16.msrb.mxu2 %v1177_v45 }
  0x4f   :  { %643 = vmatpush.bf16.msrb.mxu3 %v1305_v57  ;;  %v1591_v57 = vld [vmem:[#allocation8 + $0x48] sm:$0xff] }
  0x50   :  { %587 = vmatpush.bf16.msrb.mxu0 %v1157_v4  ;;  %v1590_v4 = vld [vmem:[#allocation8 + $0x40] sm:$0xff] }
  0x51   :  { %606 = vmatpush.bf16.msrb.mxu1 %v1285_v62 }
  0x52   :  { %625 = vmatpush.bf16.msrb.mxu2 %v1161_v58 }
  0x53   :  { %644 = vmatpush.bf16.msrb.mxu3 %v1289_v5 }
  0x54   :  { %588 = vmatpush.bf16.msrb.mxu0 %v1141_v12  ;;  %v1613_v12 = vld [vmem:[#allocation8 + $0xf8] sm:$0xff] }
  0x55   :  { %607 = vmatpush.bf16.msrb.mxu1 %v1269_v9 }
  0x56   :  { %626 = vmatpush.bf16.msrb.mxu2 %v1145_v6  ;;  %v1604_v6 = vld [vmem:[#allocation8 + $0xb0] sm:$0xff] }
  0x57   :  { %645 = vmatpush.bf16.msrb.mxu3 %v1273_v13  ;;  %589 = vmatmul.bf16.vlgmr.msrb.gmra.mxu0 %v1809_v44 }
  0x58   :  { %608 = vmatmul.bf16.vlgmr.msrb.gmra.mxu1 %v1811_v49  ;;  %1031 = vmatpush.bf16.msra.mxu0 %v1589_v14 }
  0x59   :  { %627 = vmatmul.bf16.vlgmr.msrb.gmra.mxu2 %v1809_v44  ;;  %1044 = vmatpush.bf16.msra.mxu1 %v1597_v16 }
  0x5a   :  { %646 = vmatmul.bf16.vlgmr.msrb.gmra.mxu3 %v1811_v49  ;;  %v157_v49 = vperm.slane %v1833_v17, 0  ;;  %1057 = vmatpush.bf16.msra.mxu2 %v1605_v60 }
  0x5b   :  { %1070 = vmatpush.bf16.msra.mxu3 %v1613_v12 }
  0x5c   :  { %1032 = vmatpush.bf16.msra.mxu0 %v1588_v15  ;;  %v1603_v15 = vld [vmem:[#allocation8 + $0xa8] sm:$0xff] }
  0x5d   :  { %1045 = vmatpush.bf16.msra.mxu1 %v1596_v20 }
  0x5e   :  { %1058 = vmatpush.bf16.msra.mxu2 %v1604_v6 }
  0x60   :  { %1033 = vmatpush.bf16.msra.mxu0 %v1587_v18 }
  0x61   :  { %1046 = vmatpush.bf16.msra.mxu1 %v1595_v23  ;;  %v1612_v23 = vld [vmem:[#allocation8 + $0xf0] sm:$0xff] }
  0x62   :  { %1059 = vmatpush.bf16.msra.mxu2 %v1603_v15  ;;  %1071 = vmatpush.bf16.msra.mxu3 %v1612_v23  ;;  %v1607_v23 = vld [vmem:[#allocation8 + $0xc8] sm:$0xff] }
  0x64   :  { %1034 = vmatpush.bf16.msra.mxu0 %v1586_v21 }
  0x65   :  { %1047 = vmatpush.bf16.msra.mxu1 %v1594_v32 }
  0x67   :  { %594 = vmatmul.bf16.gmra.mxu0 %v1817_v34 }
  0x68   :  { %613 = vmatmul.bf16.gmra.mxu1 %v1819_v39  ;;  %1035 = vmatpush.bf16.msra.mxu0 %v1585_v25  ;;  %v1844_v25 = vperm.slane %v1833_v17, 2 }
  0x69   :  { %632 = vmatmul.bf16.gmra.mxu2 %v1817_v34  ;;  %v1584_v34 = vld [vmem:[#allocation8 + $0x10] sm:$0xff]  ;;  %1048 = vmatpush.bf16.msra.mxu1 %v1593_v38 }
  0x6a   :  { %651 = vmatmul.bf16.gmra.mxu3 %v1819_v39 }
  0x6c   :  { %1036 = vmatpush.bf16.msra.mxu0 %v1584_v34 }
  0x6d   :  { %1049 = vmatpush.bf16.msra.mxu1 %v1592_v50 }
  0x70   :  { %1037 = vmatpush.bf16.msra.mxu0 %v1583_v41 }
  0x71   :  { %1050 = vmatpush.bf16.msra.mxu1 %v1591_v57 }
  0x74   :  { %1038 = vmatpush.bf16.msra.mxu0 %v1582_v52 }
  0x75   :  { %1051 = vmatpush.bf16.msra.mxu1 %v1590_v4 }
  0xb4   :  { %v514_v44 = vpop.f32.mrf.mxu0 }
  0xb5   :  { %v533_v19 = vpop.f32.mrf.mxu1  ;;  %v515_v22 = vadd.f32 %v514_v44, %v157_v49 }
  0xb7   :  { %v534_v29 = vadd.f32 %v533_v19, %v515_v22 }
  0xb9   :  { %v657_v36 = vmax.f32 %v534_v29, 0.0 }
  0xbc   :  { %v552_v24 = vpop.f32.mrf.mxu2  ;;  %v516_v28 = vpop.f32.mrf.mxu0 }
  0xbd   :  { %v571_v27 = vpop.f32.mrf.mxu3  ;;  %v517_v30 = vadd.f32 %v516_v28, %v157_v49  ;;  %v535_v31 = vpop.f32.mrf.mxu1  ;;  %v553_v35 = vadd.f32 %v552_v24, %v1837_v26  ;;  %v1602_v28 = vld [vmem:[#allocation8 + $0xa0] sm:$0xff] }
  0xbe   :  { %1060 = vmatpush.bf16.msra.mxu2 %v1602_v28 }
  0xbf   :  { %v536_v33 = vadd.f32 %v535_v31, %v517_v30  ;;  %v572_v42 = vadd.f32 %v571_v27, %v553_v35 }
  0xc1   :  { %v661_v37 = vmax.f32 %v536_v33, 0.0  ;;  %v658_v53 = vmax.f32 %v572_v42, 0.0 }
  0xc3   :  { %v673_v39 = vadd.f32 %v661_v37, %v657_v36  ;;  %v1601_v37 = vld [vmem:[#allocation8 + $0x98] sm:$0xff] }
  0xc4   :  { %v554_v40 = vpop.f32.mrf.mxu2  ;;  %v519_v46 = vpop.f32.mrf.mxu0  ;;  %1061 = vmatpush.bf16.msra.mxu2 %v1601_v37 }
  0xc5   :  { %v555_v43 = vadd.f32 %v554_v40, %v1837_v26  ;;  %v573_v45 = vpop.f32.mrf.mxu3  ;;  %v674_v47 = vrot.slane %v673_v39, 4  ;;  %v538_v48 = vpop.f32.mrf.mxu1  ;;  %v520_v56 = vadd.f32 %v519_v46, %v157_v49 }
  0xc7   :  { %v574_v51 = vadd.f32 %v573_v45, %v555_v43  ;;  %v675_v55 = vadd.f32 %v674_v47, %v673_v39  ;;  %v539_v1 = vadd.f32 %v538_v48, %v520_v56  ;;  %v1848_v45 = vperm.slane %v1833_v17, 3  ;;  %v1610_v48 = vld [vmem:[#allocation8 + $0xe0] sm:$0xff]  ;;  %v1609_v17 = vld [vmem:[#allocation8 + $0xd8] sm:$0xff] }
  0xc9   :  { %v662_v54 = vmax.f32 %v574_v51, 0.0  ;;  %v676_v0 = vrot.slane %v675_v55, 2  ;;  %v665_v10 = vmax.f32 %v539_v1, 0.0  ;;  %v1599_v1 = vld [vmem:[#allocation8 + $0x88] sm:$0xff] }
  0xcb   :  { %v680_v58 = vadd.f32 %v662_v54, %v658_v53  ;;  %v677_v9 = vadd.f32 %v676_v0, %v675_v55  ;;  %v1600_v54 = vld [vmem:[#allocation8 + $0x90] sm:$0xff] }
  0xcc   :  { %v557_v59 = vpop.f32.mrf.mxu2  ;;  %v521_v63 = vpop.f32.mrf.mxu0  ;;  %1062 = vmatpush.bf16.msra.mxu2 %v1600_v54 }
  0xcd   :  { %v681_v61 = vrot.slane %v680_v58, 4  ;;  %v576_v62 = vpop.f32.mrf.mxu3  ;;  %v522_v2 = vadd.f32 %v521_v63, %v157_v49  ;;  %v540_v3 = vpop.f32.mrf.mxu1  ;;  %v558_v8 = vadd.f32 %v557_v59, %v1837_v26  ;;  %v678_v19 = vrot.slane %v677_v9, 1 }
  0xcf   :  { %v541_v5 = vadd.f32 %v540_v3, %v522_v2  ;;  %v682_v7 = vadd.f32 %v681_v61, %v680_v58  ;;  %v577_v18 = vadd.f32 %v576_v62, %v558_v8  ;;  %v679_v32 = vadd.f32 %v678_v19, %v677_v9 }
  0xd0   :  { %1063 = vmatpush.bf16.msra.mxu2 %v1599_v1 }
  0xd1   :  { %v669_v11 = vmax.f32 %v541_v5, 0.0  ;;  %v683_v16 = vrot.slane %v682_v7, 2  ;;  %v666_v30 = vmax.f32 %v577_v18, 0.0  ;;  %v729_v42 = vmul.f32 0.00390625, %v679_v32 }
  0xd3   :  { %v701_v13 = vadd.f32 %v669_v11, %v665_v10  ;;  %v684_v29 = vadd.f32 %v683_v16, %v682_v7  ;;  %v738_v58 = vpack.c.bf16 %v729_v42, %v729_v42 }
  0xd4   :  { %v559_v14 = vpop.f32.mrf.mxu2  ;;  %v590_v21 = vpop.f32.mrf.mxu0 }
  0xd5   :  { %v560_v44 = vadd.f32 %v559_v14, %v1837_v26  ;;  %v578_v49 = vpop.f32.mrf.mxu3  ;;  %v702_v20 = vrot.slane %v701_v13, 4  ;;  %v609_v22 = vpop.f32.mrf.mxu1  ;;  %v1611_v26 = vld [vmem:[#allocation8 + $0xe8] sm:$0xff]  ;;  %v591_v35 = vadd.f32 %v590_v21, %v1844_v25  ;;  %v685_v38 = vrot.slane %v684_v29, 1 }
  0xd6   :  { %1072 = vmatpush.bf16.msra.mxu3 %v1611_v26  ;;  %v818_v7 = vunpack.c.l.b16 %v738_v58 }
  0xd7   :  { %v579_v24 = vadd.f32 %v578_v49, %v560_v44  ;;  %v703_v27 = vadd.f32 %v702_v20, %v701_v13  ;;  %v610_v51 = vadd.f32 %v609_v22, %v591_v35  ;;  %v686_v55 = vadd.f32 %v685_v38, %v684_v29  ;;  %v1608_v13 = vld [vmem:[#allocation8 + $0xd0] sm:$0xff]  ;;  %v1598_v44 = vld [vmem:[#allocation8 + $0x80] sm:$0xff] }
  0xd8   :  { %1064 = vmatpush.bf16.msra.mxu2 %v1598_v44  ;;  %v1606_v35 = vld [vmem:[#allocation8 + $0xc0] sm:$0xff] }
  0xd9   :  { %v670_v31 = vmax.f32 %v579_v24, 0.0  ;;  %v704_v33 = vrot.slane %v703_v27, 2  ;;  %v659_v62 = vmax.f32 %v610_v51, 0.0  ;;  %v730_v2 = vmul.f32 0.00390625, %v686_v55 }
  0xda   :  { %1073 = vmatpush.bf16.msra.mxu3 %v1610_v48 }
  0xdb   :  { %v708_v34 = vadd.f32 %v670_v31, %v666_v30  ;;  %v705_v36 = vadd.f32 %v704_v33, %v703_v27  ;;  %v739_v49 = vpack.c.bf16 %v730_v2, %v730_v2 }
  0xdc   :  { %v628_v40 = vpop.f32.mrf.mxu2  ;;  %v592_v46 = vpop.f32.mrf.mxu0 }
  0xdd   :  { %v709_v39 = vrot.slane %v708_v34, 4  ;;  %v647_v41 = vpop.f32.mrf.mxu3  ;;  %v706_v43 = vrot.slane %v705_v36, 1  ;;  %v611_v47 = vpop.f32.mrf.mxu1  ;;  %v593_v52 = vadd.f32 %v592_v46, %v1844_v25  ;;  %v629_v60 = vadd.f32 %v628_v40, %v1848_v45 }
  0xde   :  { %1074 = vmatpush.bf16.msra.mxu3 %v1609_v17  ;;  %v819_v30 = vunpack.c.l.b16 %v739_v49 }
  0xdf   :  { %v710_v50 = vadd.f32 %v709_v39, %v708_v34  ;;  %v707_v53 = vadd.f32 %v706_v43, %v705_v36  ;;  %v612_v57 = vadd.f32 %v611_v47, %v593_v52  ;;  %v648_v9 = vadd.f32 %v647_v41, %v629_v60 }
  0xe1   :  { %v711_v56 = vrot.slane %v710_v50, 2  ;;  %v733_v59 = vmul.f32 0.00390625, %v707_v53  ;;  %v663_v63 = vmax.f32 %v612_v57, 0.0  ;;  %v660_v21 = vmax.f32 %v648_v9, 0.0 }
  0xe2   :  { %1075 = vmatpush.bf16.msra.mxu3 %v1608_v13 }
  0xe3   :  { %v712_v61 = vadd.f32 %v711_v56, %v710_v50  ;;  %v742_v0 = vpack.c.bf16 %v733_v59, %v733_v59  ;;  %v687_v4 = vadd.f32 %v663_v63, %v659_v62 }
  0xe4   :  { %v630_v5 = vpop.f32.mrf.mxu2  ;;  %v595_v11 = vpop.f32.mrf.mxu0 }
  0xe5   :  { %v713_v3 = vrot.slane %v712_v61, 1  ;;  %v649_v6 = vpop.f32.mrf.mxu3  ;;  %v822_v8 = vunpack.c.l.b16 %v742_v0  ;;  %v631_v10 = vadd.f32 %v630_v5, %v1848_v45  ;;  %v614_v12 = vpop.f32.mrf.mxu1  ;;  %v688_v15 = vrot.slane %v687_v4, 4 }
  0xe6   :  { %v596_v28 = vadd.f32 %v595_v11, %v1844_v25  ;;  %1076 = vmatpush.bf16.msra.mxu3 %v1607_v23 }
  0xe7   :  { %v714_v14 = vadd.f32 %v713_v3, %v712_v61  ;;  %v650_v16 = vadd.f32 %v649_v6, %v631_v10  ;;  %v827_v18 = vsel %vm826_vm0, %v822_v8, %v818_v7  ;;  %v689_v27 = vadd.f32 %v688_v15, %v687_v4 }
  0xe8   :  { %v831_v20 = vpack.c.b16 %v827_v18, %v827_v18  ;;  %v615_v37 = vadd.f32 %v614_v12, %v596_v28 }
  0xe9   :  { %v734_v19 = vmul.f32 0.00390625, %v714_v14  ;;  %v664_v22 = vmax.f32 %v650_v16, 0.0  ;;  %v690_v36 = vrot.slane %v689_v27, 2 }
  0xea   :  { %1039 = vmatmul.bf16.vlgmr.msra.gmra.mxu0 %v831_v20  ;;  %1077 = vmatpush.bf16.msra.mxu3 %v1606_v35  ;;  %v667_v48 = vmax.f32 %v615_v37, 0.0 }
  0xeb   :  { %v743_v24 = vpack.c.bf16 %v734_v19, %v734_v19  ;;  %v694_v29 = vadd.f32 %v664_v22, %v660_v21  ;;  %v691_v47 = vadd.f32 %v690_v36, %v689_v27 }
  0xec   :  { %v633_v32 = vpop.f32.mrf.mxu2  ;;  %v597_v34 = vpop.f32.mrf.mxu0 }
  0xed   :  { %v823_v31 = vunpack.c.l.b16 %v743_v24  ;;  %v652_v33 = vpop.f32.mrf.mxu3  ;;  %v695_v26 = vrot.slane %v694_v29, 4  ;;  %v598_v38 = vadd.f32 %v597_v34, %v1844_v25  ;;  %v616_v40 = vpop.f32.mrf.mxu1  ;;  %v634_v46 = vadd.f32 %v633_v32, %v1848_v45 }
  0xee   :  { %v692_v25 = vrot.slane %v691_v47, 1 }
  0xef   :  { %v828_v39 = vsel %vm826_vm0, %v823_v31, %v819_v30  ;;  %v617_v42 = vadd.f32 %v616_v40, %v598_v38  ;;  %v696_v43 = vadd.f32 %v695_v26, %v694_v29  ;;  %v653_v54 = vadd.f32 %v652_v33, %v634_v46 }
  0xf0   :  { %v832_v41 = vpack.c.b16 %v828_v39, %v828_v39  ;;  %v693_v62 = vadd.f32 %v692_v25, %v691_v47  ;;  %v1765_v31 = vmov 0.0  }
  0xf1   :  { %v671_v50 = vmax.f32 %v617_v42, 0.0  ;;  %v697_v53 = vrot.slane %v696_v43, 2  ;;  %v668_v17 = vmax.f32 %v653_v54, 0.0  ;;  %86 = vst [vmem:[#allocation10] sm:$0x3] %v1765_v31 }
  0xf2   :  { %1052 = vmatmul.bf16.vlgmr.msra.gmra.mxu1 %v832_v41  ;;  %v731_v4 = vmul.f32 0.00390625, %v693_v62  ;;  %v1626_v41 = vld [vmem:[%s1871_s4] ss:$0 sm:$0xff] }
  0xf3   :  { %v715_v51 = vadd.f32 %v671_v50, %v667_v48  ;;  %v698_v60 = vadd.f32 %v697_v53, %v696_v43 }
  0xf4   :  { %v635_v52 = vpop.f32.mrf.mxu2  ;;  %v740_v9 = vpack.c.bf16 %v731_v4, %v731_v4 }
  0xf5   :  { %v636_v55 = vadd.f32 %v635_v52, %v1848_v45  ;;  %v716_v56 = vrot.slane %v715_v51, 4  ;;  %v654_v57 = vpop.f32.mrf.mxu3  ;;  %v699_v2 = vrot.slane %v698_v60, 1 }
  0xf6   :  { %v820_v15 = vunpack.c.l.b16 %v740_v9 }
  0xf7   :  { %v655_v58 = vadd.f32 %v654_v57, %v636_v55  ;;  %v717_v59 = vadd.f32 %v716_v56, %v715_v51  ;;  %v700_v8 = vadd.f32 %v699_v2, %v698_v60 }
  0xf8   :  { %v737_v35 = vld [vmem:[#allocation10] sm:$0x3] }
  0xf9   :  { %v672_v61 = vmax.f32 %v655_v58, 0.0  ;;  %v718_v63 = vrot.slane %v717_v59, 2  ;;  %v732_v13 = vmul.f32 0.00390625, %v700_v8 }
  0xfb   :  { %v722_v0 = vadd.f32 %v672_v61, %v668_v17  ;;  %v719_v1 = vadd.f32 %v718_v63, %v717_v59  ;;  %v741_v49 = vpack.c.bf16 %v732_v13, %v732_v13 }
  0xfd   :  { %v723_v3 = vrot.slane %v722_v0, 4  ;;  %v720_v5 = vrot.slane %v719_v1, 1  ;;  %v821_v22 = vunpack.c.l.b16 %v741_v49 }
  0xff   :  { %v724_v6 = vadd.f32 %v723_v3, %v722_v0  ;;  %v721_v7 = vadd.f32 %v720_v5, %v719_v1 }
 0x101   :  { %v725_v45 = vrot.slane %v724_v6, 2  ;;  %v735_v10 = vmul.f32 0.00390625, %v721_v7 }
 0x103   :  { %v726_v11 = vadd.f32 %v725_v45, %v724_v6  ;;  %v744_v12 = vpack.c.bf16 %v735_v10, %v735_v10 }
 0x105   :  { %v727_v14 = vrot.slane %v726_v11, 1  ;;  %v824_v16 = vunpack.c.l.b16 %v744_v12 }
 0x107   :  { %v728_v18 = vadd.f32 %v727_v14, %v726_v11  ;;  %v829_v44 = vsel %vm826_vm0, %v824_v16, %v820_v15 }
 0x108   :  { %v833_v20 = vpack.c.b16 %v829_v44, %v829_v44 }
 0x109   :  { %v736_v19 = vmul.f32 0.00390625, %v728_v18 }
 0x10a   :  { %1065 = vmatmul.bf16.vlgmr.msra.gmra.mxu2 %v833_v20 }
 0x10b   :  { %v745_v21 = vpack.c.bf16 %v736_v19, %v736_v19 }
 0x10d   :  { %v825_v23 = vunpack.c.l.b16 %v745_v21 }
 0x10f   :  { %v830_v24 = vsel %vm826_vm0, %v825_v23, %v821_v22 }
 0x110   :  { %v834_v27 = vpack.c.b16 %v830_v24, %v830_v24 }
 0x112   :  { %1078 = vmatmul.bf16.vlgmr.msra.gmra.mxu3 %v834_v27 }
 0x167   :  { %v1040_v28 = vpop.f32.mrf.mxu0 }
 0x16f   :  { %v1053_v29 = vpop.f32.mrf.mxu1  ;;  %v1042_v30 = vpop.f32.mrf.mxu0 }
 0x170   :  { %v1054_v26 = vadd.f32 %v1053_v29, %v1040_v28 }
 0x177   :  { %v1055_v32 = vpop.f32.mrf.mxu1 }
 0x18d   :  { %v1066_v33 = vpop.f32.mrf.mxu2 }
 0x18e   :  { %v1067_v34 = vadd.f32 %v1066_v33, %v1054_v26 }
 0x195   :  { %v1079_v36 = vpop.f32.mrf.mxu3  ;;  %v1068_v38 = vpop.f32.mrf.mxu2 }
 0x196   :  { %v1080_v37 = vadd.f32 %v1079_v36, %v1067_v34 }
 0x198   :  { %v1083_v39 = vadd.f32 %v1080_v37, %v737_v35 }
 0x19a   :  { %1084 = vst [vmem:[#allocation10] sm:$0x3] %v1083_v39 }
 0x19d   :  { %v1081_v40 = vpop.f32.mrf.mxu3 }
 0x1a1   :  { %v1088_v42 = vld [vmem:[#allocation10] sm:$0x3] }
 0x1a2   :  { %v1093_v43 = vadd.f32 %v1626_v41, %v1088_v42 }
 0x1a4   :  { %1094 = vst [vmem:[#allocation10] sm:$0x3] %v1093_v43 }
 0x1a5   :  { %1105 = dma.vmem_to_hbm [thread:$0]  %s1101_s18, 32, %s1103_s21, [#allocation4]  }
 0x1a6   :  { %1753 = dma.done.wait [#allocation4], 32  }
 0x1a7   :  { %1754 = vsyncadd [#allocation4], 4294967264 }
 0x1a8   :  { %1110 = vsyncpa [#allocation3], 1 }
 0x1a9   :  { %1111 = vsyncpa [#allocation6], 1 }
 0x1aa   :  { %1112 = vsyncpa [#allocation9], 1 }
 0x1ab   :  { %1113 = vsyncpa [#allocation4], 1 }

</bundles_post_ra>
